<compile_context>
chip_gen: v6e
topology: v6e:2x2x1
jax: 0.10.0
libtpu: 0.0.40
codegen_flags: <defaults>
</compile_context>

<pallas_src>
import functools

import jax
import jax.numpy as jnp
from jax.experimental import pallas as pl
from jax.experimental.pallas import tpu as pltpu

LANE = 128          # lane width (last dim)
SUBLANE = 8         # sublane group
CHUNK_ROWS = 1024   # rows per in-kernel reduction chunk (512 KiB of f32 per temp)
ALIGN = SUBLANE * LANE  # 1024 elements


def _round_up(x, m):
    return ((x + m - 1) // m) * m


def _select_tuning(input_itemsize):
    """Per-generation (block rows, vmem_limit_bytes)."""
    # Conservative default: safe on v7x (64 MiB VMEM per TensorCore) and unknown HW.
    max_blk_rows, vmem_limit = 4096, 32 * 1024 * 1024
    try:
        vmem_bytes = int(getattr(pltpu.get_tpu_info(), "vmem_capacity_bytes", 0))
        if vmem_bytes >= 96 * 1024 * 1024:  # v5e / v6e: 128 MiB VMEM per core
            max_blk_rows, vmem_limit = 8192, 64 * 1024 * 1024
    except Exception:
        pass
    if input_itemsize <= 2:  # bf16 / fp8 inputs: same bytes per block, twice the rows
        max_blk_rows *= 2
    return max_blk_rows, vmem_limit


def _gauss_nll_partial_kernel(z_ref, mu_ref, sg_ref, o_ref, *,
                              blk_rows, chunk_rows, last_block_rows):
    """Reduce a (blk_rows, 128) tile of the Gaussian NLL to an (8, 128) partial sum.

    Interior blocks use an unmasked fast path; only the last (possibly partial)
    block masks its out-of-range rows, gated by pl.when so the mask is off the
    hot path entirely.
    """
    n_chunks = blk_rows // chunk_rows

    def chunk_nll_sum(c, valid_rows):
        start = c * chunk_rows
        if not isinstance(start, int):
            start = pl.multiple_of(start, chunk_rows)
        sl = pl.ds(start, chunk_rows)
        z = z_ref[sl, :].astype(jnp.float32)
        mu = mu_ref[sl, :].astype(jnp.float32)
        sg = sg_ref[sl, :].astype(jnp.float32)

        diff = z - mu
        inv_sg = pl.reciprocal(sg, approx=False)  # EUP slot; keeps VALU free
        q = diff * inv_sg
        nll = jnp.log(sg + 1.0) + 0.5 * (q * q) + 6.0

        if valid_rows is not None:
            # Masked path (last block only): block-local row index vs static bound.
            row_ids = jax.lax.broadcasted_iota(jnp.int32, (chunk_rows, LANE), 0)
            nll = jnp.where(start + row_ids < valid_rows, nll, 0.0)

        # (chunk_rows,128) -> (chunk_rows//8, 8, 128) -> (8, 128): pure VPU adds.
        return jnp.sum(nll.reshape(chunk_rows // SUBLANE, SUBLANE, LANE), axis=0)

    def block_sum(valid_rows):
        if n_chunks == 1:
            return chunk_nll_sum(0, valid_rows)
        init = jnp.zeros((SUBLANE, LANE), jnp.float32)
        return jax.lax.fori_loop(
            0, n_chunks, lambda c, acc: acc + chunk_nll_sum(c, valid_rows), init,
            unroll=True)

    if last_block_rows == blk_rows:
        # Grid divides evenly: single unmasked path, no branch at all.
        o_ref[...] = block_sum(None)
    else:
        i = pl.program_id(0)
        last = pl.num_programs(0) - 1

        @pl.when(i != last)
        def _():
            o_ref[...] = block_sum(None)

        @pl.when(i == last)
        def _():
            o_ref[...] = block_sum(last_block_rows)


def gaussian_likelihood_loss_pallas(z, mu, sigma, size_average=True, reduction=True):
    """Pallas equivalent of GaussianLikelihoodLoss.forward."""
    if z.shape != mu.shape or z.shape != sigma.shape:
        z, mu, sigma = jnp.broadcast_arrays(z, mu, sigma)

    n = z.size
    out_dtype = jnp.result_type(z.dtype, mu.dtype, sigma.dtype)

    z_flat = z.reshape(-1)
    mu_flat = mu.reshape(-1)
    sg_flat = sigma.reshape(-1)

    aligned_n = (n // ALIGN) * ALIGN  # kernel sees only the 1024-aligned prefix
    total = jnp.zeros((), jnp.float32)

    if aligned_n:
        rows = aligned_n // LANE  # multiple of 8
        itemsize = max(z_flat.dtype.itemsize, mu_flat.dtype.itemsize,
                       sg_flat.dtype.itemsize)
        max_blk_rows, vmem_limit = _select_tuning(itemsize)

        if rows <= CHUNK_ROWS:
            blk_rows = rows  # single block, single chunk
        else:
            # Target >= ~4 blocks (balanced across v7x's 2 TCs), chunk-aligned.
            blk_rows = min(max_blk_rows, _round_up(pl.cdiv(rows, 4), CHUNK_ROWS))
        chunk_rows = min(CHUNK_ROWS, blk_rows)
        grid = pl.cdiv(rows, blk_rows)
        last_block_rows = rows - (grid - 1) * blk_rows

        def to2d(a):
            return a[:aligned_n].reshape(rows, LANE)  # no full-array pad copy

        partials = pl.pallas_call(
            functools.partial(_gauss_nll_partial_kernel,
                              blk_rows=blk_rows, chunk_rows=chunk_rows,
                              last_block_rows=last_block_rows),
            out_shape=jax.ShapeDtypeStruct((grid * SUBLANE, LANE), jnp.float32),
            grid_spec=pltpu.PrefetchScalarGridSpec(
                num_scalar_prefetch=0,
                grid=(grid,),
                in_specs=[
                    pl.BlockSpec((blk_rows, LANE), lambda i: (i, 0)),
                    pl.BlockSpec((blk_rows, LANE), lambda i: (i, 0)),
                    pl.BlockSpec((blk_rows, LANE), lambda i: (i, 0)),
                ],
                out_specs=pl.BlockSpec((SUBLANE, LANE), lambda i: (i, 0)),
            ),
            compiler_params=pltpu.CompilerParams(
                dimension_semantics=("parallel",),  # independent blocks -> both v7x TCs
                vmem_limit_bytes=vmem_limit,
            ),
        )(to2d(z_flat), to2d(mu_flat), to2d(sg_flat))
        total = total + jnp.sum(partials)  # tiny final cross-lane reduce

    tail_n = n - aligned_n
    if tail_n:
        # < 1024-element ragged tail: plain jnp, negligible HBM traffic.
        zt = z_flat[aligned_n:].astype(jnp.float32)
        mt = mu_flat[aligned_n:].astype(jnp.float32)
        st = sg_flat[aligned_n:].astype(jnp.float32)
        nll_tail = jnp.log(st + 1.0) + (zt - mt) ** 2 / (2.0 * st * st) + 6.0
        total = total + jnp.sum(nll_tail)

    if reduction:
        if size_average:
            return (total / n).astype(out_dtype)
        return total.astype(out_dtype)
    # TODO(synk): reduction=False returns None in the reference module (no else branch).
    return None


if __name__ == "__main__":
    key = jax.random.PRNGKey(0)

    def make(shape, salt):
        kz, km, ks = jax.random.split(jax.random.fold_in(key, salt), 3)
        z = jax.random.normal(kz, shape, dtype=jnp.float32)
        mu = jax.random.normal(km, shape, dtype=jnp.float32)
        sg = jax.random.uniform(ks, shape, dtype=jnp.float32, minval=0.5, maxval=2.0)
        return z, mu, sg

    def ref_nll(z, mu, sg):
        return jnp.log(sg + 1.0) + (z - mu) ** 2 / (2.0 * sg ** 2) + 6.0

    # Case 1 — small (num_ts, num_periods): one kernel block + <1024-element tail path.
    z, mu, sg = make((8, 160), 1)
    loss_mean = gaussian_likelihood_loss_pallas(z, mu, sg)                    # mean
    loss_sum = gaussian_likelihood_loss_pallas(z, mu, sg, size_average=False)  # sum
    jax.block_until_ready((loss_mean, loss_sum))
    assert jnp.allclose(loss_mean, jnp.mean(ref_nll(z, mu, sg)), rtol=1e-5, atol=1e-6), \
        (loss_mean, jnp.mean(ref_nll(z, mu, sg)))
    assert jnp.allclose(loss_sum, jnp.sum(ref_nll(z, mu, sg)), rtol=1e-5), \
        (loss_sum, jnp.sum(ref_nll(z, mu, sg)))

    # Case 2 — multi-block grid: exercises the chunked fori_loop fast path,
    # the pl.when-masked partial last block, and the parallel grid split.
    z, mu, sg = make((8200, 128), 2)
    loss_mean = gaussian_likelihood_loss_pallas(z, mu, sg)
    loss_sum = gaussian_likelihood_loss_pallas(z, mu, sg, size_average=False)
    jax.block_until_ready((loss_mean, loss_sum))
    assert jnp.allclose(loss_mean, jnp.mean(ref_nll(z, mu, sg)), rtol=1e-3), \
        (loss_mean, jnp.mean(ref_nll(z, mu, sg)))
    assert jnp.allclose(loss_sum, jnp.sum(ref_nll(z, mu, sg)), rtol=1e-3), \
        (loss_sum, jnp.sum(ref_nll(z, mu, sg)))

    print("KERNEL_OK")
</pallas_src>

<mosaic_0001>
module attributes {stable_mosaic.version = 11 : i64} {
  func.func @_gauss_nll_partial_kernel(%arg0: i32, %arg1: memref<8x128xf32, #tpu.memory_space<vmem>>, %arg2: memref<8x128xf32, #tpu.memory_space<vmem>>, %arg3: memref<8x128xf32, #tpu.memory_space<vmem>>, %arg4: memref<8x128xf32, #tpu.memory_space<vmem>>) attributes {dimension_semantics = [#tpu.dimension_semantics<parallel>], iteration_bounds = array<i64: 1>, scalar_prefetch = 0 : i64, scratch_operands = 0 : i64, tpu.core_type = #tpu.core_type<tc>, window_params = [{transform_indices = @transform_0, window_bounds = array<i64: 8, 128>}, {transform_indices = @transform_1, window_bounds = array<i64: 8, 128>}, {transform_indices = @transform_2, window_bounds = array<i64: 8, 128>}, {transform_indices = @transform_3, window_bounds = array<i64: 8, 128>}]} {
    %c0 = arith.constant 0 : index
    %c0_0 = arith.constant 0 : index
    %0 = vector.load %arg1[%c0, %c0_0] : memref<8x128xf32, #tpu.memory_space<vmem>>, vector<8x128xf32>
    %c0_1 = arith.constant 0 : index
    %c0_2 = arith.constant 0 : index
    %1 = vector.load %arg2[%c0_1, %c0_2] : memref<8x128xf32, #tpu.memory_space<vmem>>, vector<8x128xf32>
    %c0_3 = arith.constant 0 : index
    %c0_4 = arith.constant 0 : index
    %2 = vector.load %arg3[%c0_3, %c0_4] : memref<8x128xf32, #tpu.memory_space<vmem>>, vector<8x128xf32>
    %3 = arith.subf %0, %1 : vector<8x128xf32>
    %4 = tpu.reciprocal %2 : vector<8x128xf32> -> vector<8x128xf32>
    %5 = arith.mulf %3, %4 : vector<8x128xf32>
    %cst = arith.constant 1.000000e+00 : f32
    %6 = vector.broadcast %cst : f32 to vector<8x128xf32>
    %7 = arith.addf %2, %6 : vector<8x128xf32>
    %8 = math.log %7 : vector<8x128xf32>
    %9 = arith.mulf %5, %5 : vector<8x128xf32>
    %cst_5 = arith.constant 5.000000e-01 : f32
    %10 = vector.broadcast %cst_5 : f32 to vector<8x128xf32>
    %11 = arith.mulf %10, %9 : vector<8x128xf32>
    %12 = arith.addf %8, %11 : vector<8x128xf32>
    %cst_6 = arith.constant 6.000000e+00 : f32
    %13 = vector.broadcast %cst_6 : f32 to vector<8x128xf32>
    %14 = arith.addf %12, %13 : vector<8x128xf32>
    %15 = vector.shape_cast %14 : vector<8x128xf32> to vector<1x8x128xf32>
    %cst_7 = arith.constant dense<0.000000e+00> : vector<8x128xf32>
    %16 = vector.multi_reduction <add>, %15, %cst_7 [0] : vector<1x8x128xf32> to vector<8x128xf32>
    %c0_8 = arith.constant 0 : index
    %c0_9 = arith.constant 0 : index
    %17 = vector.load %arg4[%c0_8, %c0_9] : memref<8x128xf32, #tpu.memory_space<vmem>>, vector<8x128xf32>
    tpu.vector_store %arg4[%c0_8, %c0_9], %16 {strides = array<i32>} : memref<8x128xf32, #tpu.memory_space<vmem>>, vector<8x128xf32>,
    return
  }
  func.func @transform_0(%arg0: i32) -> (i32, i32) {
    %c0_i32 = arith.constant 0 : i32
    %c0_i32_0 = arith.constant 0 : i32
    return %arg0, %c0_i32 : i32, i32
  }
  func.func @transform_1(%arg0: i32) -> (i32, i32) {
    %c0_i32 = arith.constant 0 : i32
    %c0_i32_0 = arith.constant 0 : i32
    return %arg0, %c0_i32 : i32, i32
  }
  func.func @transform_2(%arg0: i32) -> (i32, i32) {
    %c0_i32 = arith.constant 0 : i32
    %c0_i32_0 = arith.constant 0 : i32
    return %arg0, %c0_i32 : i32, i32
  }
  func.func @transform_3(%arg0: i32) -> (i32, i32) {
    %c0_i32 = arith.constant 0 : i32
    %c0_i32_0 = arith.constant 0 : i32
    return %arg0, %c0_i32 : i32, i32
  }
}

</mosaic_0001>

<bundles_post_ra>
// kernel: tpu_custom_call.1
= control target key start
LH: loop header
LB: loop body
LE: loop exit
PB: predicated region body
PF: predicated region fallthrough
CT: control target
= control target key end

     0   :  { %8 = vsyncpa [#allocation3], 0  ;;  %s211_s0 = inlined_call_operand.hbm [shape: f32[8,128], index: 0, kind: input, shape index: {}]   ;;  %s212_s1 = inlined_call_operand.hbm [shape: f32[8,128], index: 1, kind: input, shape index: {}]   ;;  %s213_s2 = inlined_call_operand.hbm [shape: f32[8,128], index: 2, kind: input, shape index: {}]   ;;  %s214_s3 = inlined_call_operand.hbm [shape: f32[8,128], index: 3, kind: output, shape index: {}]  }
   0x1   :  { %9 = vsyncpa [#allocation6], 0 }
   0x2   :  { %10 = vsyncpa [#allocation4], 0  ;;  %s175_s12 = smov [#allocation5]   ;;  %s176_s14 = smov [#allocation2]  }
   0x3   :  { %s27_s13 = sshll.u32 %s175_s12, 4  ;;  %s17_s15 = sshll.u32 %s176_s14, 4  ;;  %s28_s13 = int_to_ptr.vmem [resolvable:$true] %s27_s13  ;;  %s18_s15 = int_to_ptr.vmem [resolvable:$true] %s17_s15 }
   0x4   :  { %s97_s16 = scalar_lea.vmem %s28_s13, 128  ;;  %p102_p1 = scmp.lt.s32.totalorder %s28_s13, %s28_s13 }
   0x5   :  { %p98_p0 = scmp.ne.s32.totalorder %s28_s13, %s97_s16  ;;  %p103_p2 = scmp.lt.s32.totalorder %s97_s16, %s97_s16 }
   0x7   :  { %p104_p3 = por %p103_p2, %p102_p1 }
   0x9   :  { %p105_p4 = pnand %p104_p3, %p98_p0 }
   0xb   :  { %108 = shalt.err (!%p105_p4)
}
   0xc   :  { %30 = dma.hbm_to_vmem [thread:$0]  %s212_s1, 128, %s28_s13, [#allocation6]  }
   0xd   :  { %s117_s19 = scalar_lea.vmem %s18_s15, 128  ;;  %p122_p6 = scmp.lt.s32.totalorder %s18_s15, %s18_s15 }
   0xe   :  { %p118_p5 = scmp.ne.s32.totalorder %s18_s15, %s117_s19  ;;  %p123_p7 = scmp.lt.s32.totalorder %s117_s19, %s117_s19 }
  0x10   :  { %p124_p8 = por %p123_p7, %p122_p6 }
  0x12   :  { %p125_p9 = pnand %p124_p8, %p118_p5 }
  0x14   :  { %128 = shalt.err (!%p125_p9)
}
  0x15   :  { %20 = dma.hbm_to_vmem [thread:$0]  %s211_s0, 128, %s18_s15, [#allocation3]  }
  0x16   :  { %s177_s22 = smov [#allocation7]  }
  0x17   :  { %s37_s23 = sshll.u32 %s177_s22, 4  ;;  %s38_s23 = int_to_ptr.vmem [resolvable:$true] %s37_s23 }
  0x18   :  { %s137_s24 = scalar_lea.vmem %s38_s23, 128  ;;  %p142_p11 = scmp.lt.s32.totalorder %s38_s23, %s38_s23 }
  0x19   :  { %p138_p10 = scmp.ne.s32.totalorder %s38_s23, %s137_s24  ;;  %p143_p12 = scmp.lt.s32.totalorder %s137_s24, %s137_s24 }
  0x1b   :  { %p144_p13 = por %p143_p12, %p142_p11 }
  0x1d   :  { %p145_p0 = pnand %p144_p13, %p138_p10 }
  0x1f   :  { %148 = shalt.err (!%p145_p0)
}
  0x20   :  { %40 = dma.hbm_to_vmem [thread:$0]  %s213_s2, 128, %s38_s23, [#allocation6]  }
  0x21   :  { %169 = dma.done.wait [#allocation3], 128  }
  0x22   :  { %170 = vsyncadd [#allocation3], 4294967168 }
  0x23   :  { %171 = dma.done.wait [#allocation6], 256  }
  0x24   :  { %172 = vsyncadd [#allocation6], 4294967040  ;;  %v52_v0 = vld [vmem:[#allocation7] sm:$0xff]  ;;  %v50_v2 = vld [vmem:[#allocation2] sm:$0xff]  ;;  %s178_s0 = smov [#allocation8]  }
  0x25   :  { %85 = vrcp.f32 %v52_v0  ;;  %v56_v1 = vadd.f32 1.0, %v52_v0  ;;  %v51_v3 = vld [vmem:[#allocation5] sm:$0xff]  ;;  %s71_s26 = sshll.u32 %s178_s0, 4  ;;  %s72_s26 = int_to_ptr.vmem [resolvable:$true] %s71_s26 }
  0x26   :  { %v53_v4 = vsub.f32 %v50_v2, %v51_v3  ;;  %s149_s2 = scalar_lea.vmem %s72_s26, 128  ;;  %p154_p2 = scmp.lt.s32.totalorder %s72_s26, %s72_s26 }
  0x27   :  { %87 = vlog2.f32 %v56_v1  ;;  %p150_p1 = scmp.ne.s32.totalorder %s72_s26, %s149_s2  ;;  %p155_p3 = scmp.lt.s32.totalorder %s149_s2, %s149_s2 }
  0x29   :  { %p156_p4 = por %p155_p3, %p154_p2 }
  0x2b   :  { %p157_p5 = pnand %p156_p4, %p150_p1 }
  0x32   :  { %v86_v5 = vpop.eup %85 }
  0x33   :  { %v55_v6 = vmul.f32 %v86_v5, %v53_v4 }
  0x34   :  { %v88_v7 = vpop.eup %87 }
  0x35   :  { %v58_v8 = vmul.f32 0.6931472, %v88_v7  ;;  %v59_v9 = vmul.f32 %v55_v6, %v55_v6 }
  0x37   :  { %v60_v10 = vmul.f32 0.5, %v59_v9 }
  0x39   :  { %v61_v11 = vadd.f32 %v60_v10, %v58_v8 }
  0x3b   :  { %v62_v12 = vadd.f32 6.0, %v61_v11 }
  0x3d   :  { %64 = vst [vmem:[#allocation8] sm:$0xff] %v62_v12 }
  0x3e   :  { %160 = shalt.err (!%p157_p5)
}
  0x3f   :  { %74 = dma.vmem_to_hbm [thread:$0]  %s72_s26, 128, %s214_s3, [#allocation4]  }
  0x40   :  { %173 = dma.done.wait [#allocation4], 128  }
  0x41   :  { %174 = vsyncadd [#allocation4], 4294967168 }
  0x42   :  { %78 = vsyncpa [#allocation3], 1 }
  0x43   :  { %79 = vsyncpa [#allocation6], 1 }
  0x44   :  { %80 = vsyncpa [#allocation4], 1 }

</bundles_post_ra>
